<compile_context>
chip_gen: v6e
topology: v6e:2x2x1
jax: 0.10.0
libtpu: 0.0.40
codegen_flags: <defaults>
</compile_context>

<pallas_src>
import jax
import jax.numpy as jnp
from jax.experimental import pallas as pl
from jax.experimental.pallas import tpu as pltpu


def _round_up(x, m):
    return ((x + m - 1) // m) * m


def _sublane_multiple(dtype):
    itemsize = jnp.dtype(dtype).itemsize
    if itemsize >= 4:
        return 8
    if itemsize == 2:
        return 16
    return 32


def _chip_config():
    """Returns (num_tensorcores, resident_vmem_budget, vmem_limit_cap)."""
    try:
        vmem = int(pltpu.get_tpu_info().vmem_capacity_bytes)
    except Exception:
        vmem = 0
    if vmem >= (96 << 20):          # v5e / v6e: 128 MiB physical VMEM, 1 TC
        return 1, 80 << 20, 112 << 20
    if vmem > 0:                    # v7x-like: 64 MiB per TC, 2 TCs
        return 2, 36 << 20, 56 << 20
    # unknown backend / query unavailable: assume the most restrictive layout
    return 2, 32 << 20, 48 << 20


# ----------------------------- kernels --------------------------------------


def _linear_resident_kernel(x_ref, w_ref, b_ref, o_ref):
    """Weight-resident path: full-K, full-N weight stays in VMEM; grid over M."""
    x = x_ref[...]
    w = w_ref[...]
    if x.dtype != w.dtype:          # opt-in bf16 compute: cast x tile in VREGs
        x = x.astype(w.dtype)
    o_ref[...] = (
        jnp.dot(x, w, preferred_element_type=jnp.float32) + b_ref[...]
    ).astype(o_ref.dtype)


def _linear_tiled_kernel_f32(x_ref, w_ref, b_ref, o_ref):
    """Tiled K-accumulation, f32 output: accumulate directly into o_ref."""
    k = pl.program_id(2)

    @pl.when(k == 0)
    def _():
        o_ref[...] = jnp.broadcast_to(b_ref[...], o_ref.shape)

    x = x_ref[...]
    w = w_ref[...]
    if x.dtype != w.dtype:
        x = x.astype(w.dtype)
    o_ref[...] += jnp.dot(x, w, preferred_element_type=jnp.float32)


def _linear_tiled_kernel_acc(x_ref, w_ref, b_ref, o_ref, acc_ref):
    """Tiled K-accumulation, generic output dtype: f32 scratch accumulator."""
    k = pl.program_id(2)

    @pl.when(k == 0)
    def _():
        acc_ref[...] = jnp.broadcast_to(b_ref[...], acc_ref.shape)

    x = x_ref[...]
    w = w_ref[...]
    if x.dtype != w.dtype:
        x = x.astype(w.dtype)
    acc_ref[...] += jnp.dot(x, w, preferred_element_type=jnp.float32)

    @pl.when(k == pl.num_programs(2) - 1)
    def _():
        o_ref[...] = acc_ref[...].astype(o_ref.dtype)


# ----------------------------- linear wrapper --------------------------------


class PallasLinear:
    """y = x @ W^T + b with padded weight/bias cached once at construction."""

    def __init__(self, weight, bias, *, compute_dtype=None,
                 weight_resident=None, tm=None, tn=None, tk=None):
        # weight: (out_features, in_features) — PyTorch nn.Linear layout
        out_features, in_features = weight.shape
        self.K = int(in_features)
        self.N = int(out_features)
        self.compute_dtype = (jnp.dtype(compute_dtype) if compute_dtype is not None
                              else jnp.dtype(weight.dtype))
        self.num_cores, self.budget, self.vmem_cap = _chip_config()
        self.tm_hint = tm

        # unpadded (K, N) transpose cached once (small-problem bypass / refs)
        self.w_t = jnp.asarray(weight.T)
        self.bias = jnp.asarray(bias)

        w_item = self.compute_dtype.itemsize
        if weight_resident is None:
            weight_resident = self._resident_fits(tm or 256, w_item)
        self.weight_resident = bool(weight_resident)

        w_compute = self.w_t.astype(self.compute_dtype)
        bias2d = self.bias.reshape(1, self.N).astype(jnp.float32)

        if self.weight_resident:
            self.n_pad = _round_up(self.N, 128)
            self.w_pad = jnp.pad(w_compute, ((0, 0), (0, self.n_pad - self.N)))
            self.b_pad = jnp.pad(bias2d, ((0, 0), (0, self.n_pad - self.N)))
        else:
            self.tn = int(tn) if tn is not None else self._pick_tile(self.N, 1024)
            self.tk = int(tk) if tk is not None else self._pick_tile(self.K, 512)
            self.n_pad = _round_up(self.N, self.tn)
            self.k_pad = _round_up(self.K, self.tk)
            self.w_pad = jnp.pad(
                w_compute,
                ((0, self.k_pad - self.K), (0, self.n_pad - self.N)))
            self.b_pad = jnp.pad(bias2d, ((0, 0), (0, self.n_pad - self.N)))

    # ---- sizing helpers ----

    def _resident_fits(self, tm, w_item):
        n_pad = _round_up(self.N, 128)
        # weight single-buffered (constant index_map -> pl.Buffered(1));
        # x / out tiles double-buffered; x/out assumed f32 worst case.
        need = (self.K * n_pad * w_item
                + 2 * tm * self.K * 4
                + 2 * tm * n_pad * 4
                + 2 * n_pad * 4)
        return need + (2 << 20) <= self.budget

    @staticmethod
    def _pick_tile(dim, max_tile):
        """Largest multiple-of-128 tile <= max_tile that divides ceil(dim,128)."""
        r = _round_up(dim, 128)
        if r <= max_tile:
            return r
        t = max_tile
        while t > 128 and r % t:
            t -= 128
        return t if r % t == 0 else max_tile

    # ---- forward ----

    def __call__(self, x2d):
        M, K = x2d.shape
        assert K == self.K
        if self.weight_resident:
            return self._call_resident(x2d)
        return self._call_tiled(x2d)

    def _call_resident(self, x2d):
        M, K = x2d.shape
        out_dtype = x2d.dtype
        sub_m = _sublane_multiple(x2d.dtype)
        n_pad = self.n_pad

        tm = self.tm_hint if self.tm_hint is not None else 256
        tm = _round_up(min(tm, _round_up(M, sub_m)), sub_m)
        m_pad = _round_up(M, tm)
        if self.num_cores >= 2:
            # v7x megacore: aim for >= 2 grid steps per TensorCore, tm >= 128
            target = 2 * self.num_cores
            if m_pad // tm < target and m_pad >= target * 128:
                tm = max(128, _round_up(m_pad // target, sub_m))
                m_pad = _round_up(M, tm)

        x_p = x2d if m_pad == M else jnp.pad(x2d, ((0, m_pad - M), (0, 0)))

        w_item = self.compute_dtype.itemsize
        base_need = (K * n_pad * w_item
                     + 2 * tm * K * jnp.dtype(x2d.dtype).itemsize
                     + 2 * tm * n_pad * jnp.dtype(out_dtype).itemsize
                     + 2 * n_pad * 4 + (2 << 20))
        vmem_limit = min(max(base_need, self.budget), self.vmem_cap)

        def build(single_buffer, limit):
            const_kw = {"pipeline_mode": pl.Buffered(1)} if single_buffer else {}
            return pl.pallas_call(
                _linear_resident_kernel,
                out_shape=jax.ShapeDtypeStruct((m_pad, n_pad), out_dtype),
                grid_spec=pltpu.PrefetchScalarGridSpec(
                    num_scalar_prefetch=0,
                    grid=(m_pad // tm,),
                    in_specs=[
                        pl.BlockSpec((tm, K), lambda i: (i, 0)),              # x tile
                        pl.BlockSpec((K, n_pad), lambda i: (0, 0), **const_kw),  # weight
                        pl.BlockSpec((1, n_pad), lambda i: (0, 0), **const_kw),  # bias
                    ],
                    out_specs=pl.BlockSpec((tm, n_pad), lambda i: (i, 0)),
                ),
                compiler_params=pltpu.CompilerParams(
                    dimension_semantics=("parallel",),
                    vmem_limit_bytes=int(limit),
                ),
            )

        try:
            out = build(True, vmem_limit)(x_p, self.w_pad, self.b_pad)
        except Exception:
            # pipeline_mode=pl.Buffered(1) unsupported on this jax build:
            # fall back to default double-buffering with a larger VMEM limit.
            fb_limit = min(vmem_limit + K * n_pad * w_item, self.vmem_cap)
            out = build(False, fb_limit)(x_p, self.w_pad, self.b_pad)

        return out[:M, :self.N]

    def _call_tiled(self, x2d):
        M, K = x2d.shape
        out_dtype = x2d.dtype
        sub_m = _sublane_multiple(x2d.dtype)
        tn, tk = self.tn, self.tk
        n_pad, k_pad = self.n_pad, self.k_pad

        tm = self.tm_hint if self.tm_hint is not None else (
            256 if self.num_cores >= 2 else 512)
        tm = _round_up(min(tm, _round_up(M, sub_m)), sub_m)
        m_pad = _round_up(M, tm)

        x_p = x2d
        if m_pad != M or k_pad != K:
            x_p = jnp.pad(x2d, ((0, m_pad - M), (0, k_pad - K)))

        x_item = jnp.dtype(x2d.dtype).itemsize
        w_item = self.compute_dtype.itemsize
        o_item = jnp.dtype(out_dtype).itemsize
        need = (2 * (tm * tk * x_item + tk * tn * w_item + tm * tn * o_item)
                + tm * tn * 4 + 2 * tn * 4 + (2 << 20))
        vmem_limit = min(max(need, 32 << 20), self.vmem_cap)

        grid = (m_pad // tm, n_pad // tn, k_pad // tk)
        in_specs = [
            pl.BlockSpec((tm, tk), lambda i, j, k: (i, k)),   # x tile
            pl.BlockSpec((tk, tn), lambda i, j, k: (k, j)),   # W^T tile
            pl.BlockSpec((1, tn), lambda i, j, k: (0, j)),    # bias tile
        ]
        out_spec = pl.BlockSpec((tm, tn), lambda i, j, k: (i, j))

        if out_dtype == jnp.float32:
            kernel, scratch = _linear_tiled_kernel_f32, []
        else:
            kernel = _linear_tiled_kernel_acc
            scratch = [pltpu.VMEM((tm, tn), jnp.float32)]

        out = pl.pallas_call(
            kernel,
            out_shape=jax.ShapeDtypeStruct((m_pad, n_pad), out_dtype),
            grid_spec=pltpu.PrefetchScalarGridSpec(
                num_scalar_prefetch=0,
                grid=grid,
                in_specs=in_specs,
                out_specs=out_spec,
                scratch_shapes=scratch,
            ),
            compiler_params=pltpu.CompilerParams(
                dimension_semantics=("parallel", "parallel", "arbitrary"),
                vmem_limit_bytes=int(vmem_limit),
            ),
        )(x_p, self.w_pad, self.b_pad)
        return out[:M, :self.N]


# ----------------------------- module ----------------------------------------


class MRMHeadL1Pallas:
    """JAX/Pallas equivalent of MRMHead_L1 (forward pass)."""

    # below this many MACs, XLA's fused linear beats the Pallas launch overhead
    _SMALL_PROBLEM_MACS = 1 << 20

    def __init__(self, input_size, output_size, key,
                 mrm_loss_weight=1.0, anneal_factor=0.1,
                 anneal_every_n_epochs=10, compute_dtype=None):
        self.input_size = input_size
        self.output_size = output_size
        self.mrm_loss_weight = mrm_loss_weight
        self.anneal_factor = anneal_factor
        self.anneal_every_n_epochs = anneal_every_n_epochs
        self._compute_dtype = compute_dtype
        # _init_weights: Linear weight ~ N(0, 0.02), bias = 0
        wkey, _ = jax.random.split(key)
        # PyTorch Linear stores weight as (out_features, in_features)
        self.weight = 0.02 * jax.random.normal(
            wkey, (output_size, input_size), jnp.float32)
        self.bias = jnp.zeros((output_size,), jnp.float32)
        self._rebuild_linear()

    def _rebuild_linear(self):
        # Cached (padded / transposed / compute-dtype) weights live inside
        # PallasLinear. Forward-only module; call update_weights() if the
        # raw weight/bias are ever mutated so the cache is never stale.
        self.linear = PallasLinear(self.weight, self.bias,
                                   compute_dtype=self._compute_dtype)

    def update_weights(self, weight, bias):
        self.weight = jnp.asarray(weight)
        self.bias = jnp.asarray(bias)
        self._rebuild_linear()

    def anneal_weights(self, epoch):
        if epoch > 0 and epoch % self.anneal_every_n_epochs == 0:
            self.mrm_loss_weight *= self.anneal_factor

    def __call__(self, x):
        # x: (batch, seq, input_size) -> (batch, seq, output_size)
        b, s, k = x.shape
        assert k == self.input_size
        m = b * s
        x2d = x.reshape(m, k)
        if m * k * self.output_size < self._SMALL_PROBLEM_MACS:
            # small-problem bypass: per-grid-step + launch overhead dominates
            out2d = (jnp.dot(x2d, self.linear.w_t) + self.bias).astype(x.dtype)
        else:
            out2d = self.linear(x2d)
        return out2d.reshape(b, s, self.output_size)

    def loss_fn(self, feat, gt_img_spec):
        # L1ReconstructionLoss equivalent (plain JAX glue, not a kernel)
        pred = self(feat)
        return self.mrm_loss_weight * jnp.mean(jnp.abs(pred - gt_img_spec))


# ----------------------------- demo / checks ---------------------------------

if __name__ == "__main__":
    key = jax.random.PRNGKey(0)
    pkey, xkey, x2key, tkey, gkey = jax.random.split(key, 5)

    # 1) main demo: weight-resident Pallas path (lane-dense N, cached padded
    #    weight, single-buffered resident weight, explicit vmem_limit_bytes).
    batch, seq, input_size, output_size = 2, 64, 256, 256
    head = MRMHeadL1Pallas(input_size, output_size, pkey)
    x = jax.random.normal(xkey, (batch, seq, input_size), jnp.float32)
    out = jax.block_until_ready(head(x))
    ref = x @ head.weight.T + head.bias
    assert out.shape == (batch, seq, output_size)
    assert jnp.allclose(out, ref, atol=1e-4, rtol=1e-4)

    # loss_fn sanity check (L1 reconstruction)
    gt = jax.random.normal(gkey, (batch, seq, output_size), jnp.float32)
    loss = jax.block_until_ready(head.loss_fn(x, gt))
    assert loss.shape == ()

    # 2) tiny head shape: exercises the small-problem bypass path.
    head_s = MRMHeadL1Pallas(32, 64, pkey)
    xs = jax.random.normal(x2key, (2, 8, 32), jnp.float32)
    out_s = jax.block_until_ready(head_s(xs))
    ref_s = xs @ head_s.weight.T + head_s.bias
    assert jnp.allclose(out_s, ref_s, atol=1e-5, rtol=1e-5)

    # 3) general tiled K-accumulation path (forced), N not a tile multiple,
    #    checks padding/slicing and the cached-padded-weight path.
    M, K, N = 256, 512, 384
    akey, wkey2, bkey2 = jax.random.split(tkey, 3)
    a = jax.random.normal(akey, (M, K), jnp.float32)
    w = 0.02 * jax.random.normal(wkey2, (N, K), jnp.float32)   # (out, in)
    bvec = jax.random.normal(bkey2, (N,), jnp.float32)
    lin_t = PallasLinear(w, bvec, weight_resident=False, tm=128, tn=128, tk=128)
    out_t = jax.block_until_ready(lin_t(a))
    ref_t = a @ w.T + bvec
    assert jnp.allclose(out_t, ref_t, atol=1e-4, rtol=1e-4)

    # 4) opt-in bf16 compute mode (weight stored bf16, f32 MXU accumulation).
    head_bf = MRMHeadL1Pallas(input_size, output_size, pkey,
                              compute_dtype=jnp.bfloat16)
    out_bf = jax.block_until_ready(head_bf(x))
    assert jnp.allclose(out_bf, ref, atol=5e-2, rtol=5e-2)

    print("KERNEL_OK")
</pallas_src>

<mosaic_0001>
module attributes {stable_mosaic.version = 11 : i64} {
  func.func @_linear_resident_kernel(%arg0: i32, %arg1: memref<128x256xf32, #tpu.memory_space<vmem>>, %arg2: memref<256x256xf32, #tpu.memory_space<vmem>>, %arg3: memref<1x256xf32, #tpu.memory_space<vmem>>, %arg4: memref<128x256xf32, #tpu.memory_space<vmem>>) attributes {dimension_semantics = [#tpu.dimension_semantics<parallel>], iteration_bounds = array<i64: 1>, scalar_prefetch = 0 : i64, scratch_operands = 0 : i64, tpu.core_type = #tpu.core_type<tc>, window_params = [{transform_indices = @transform_0, window_bounds = array<i64: 128, 256>}, {pipeline_mode = #tpu.pipeline_mode<synchronous>, transform_indices = @transform_1, window_bounds = array<i64: 256, 256>}, {pipeline_mode = #tpu.pipeline_mode<synchronous>, transform_indices = @transform_2, window_bounds = array<i64: 1, 256>}, {transform_indices = @transform_3, window_bounds = array<i64: 128, 256>}]} {
    %c0 = arith.constant 0 : index
    %c0_0 = arith.constant 0 : index
    %0 = vector.load %arg1[%c0, %c0_0] : memref<128x256xf32, #tpu.memory_space<vmem>>, vector<128x256xf32>
    %c0_1 = arith.constant 0 : index
    %c0_2 = arith.constant 0 : index
    %1 = vector.load %arg2[%c0_1, %c0_2] : memref<256x256xf32, #tpu.memory_space<vmem>>, vector<256x256xf32>
    %cst = arith.constant dense<0.000000e+00> : vector<128x256xf32>
    %2 = tpu.matmul %0, %1, %cst {dimension_numbers = #tpu.dot_dimension_numbers<[1], [0], [0], [1], [0, 0, 1, 1], [], []>} : vector<128x256xf32>, vector<256x256xf32>, vector<128x256xf32> -> vector<128x256xf32>
    %c0_3 = arith.constant 0 : index
    %c0_4 = arith.constant 0 : index
    %3 = vector.load %arg3[%c0_3, %c0_4] : memref<1x256xf32, #tpu.memory_space<vmem>>, vector<1x256xf32>
    %4 = vector.broadcast %3 : vector<1x256xf32> to vector<128x256xf32>
    %5 = arith.addf %2, %4 : vector<128x256xf32>
    %c0_5 = arith.constant 0 : index
    %c0_6 = arith.constant 0 : index
    %6 = vector.load %arg4[%c0_5, %c0_6] : memref<128x256xf32, #tpu.memory_space<vmem>>, vector<128x256xf32>
    tpu.vector_store %arg4[%c0_5, %c0_6], %5 {strides = array<i32>} : memref<128x256xf32, #tpu.memory_space<vmem>>, vector<128x256xf32>,
    return
  }
  func.func @transform_0(%arg0: i32) -> (i32, i32) {
    %c0_i32 = arith.constant 0 : i32
    %c0_i32_0 = arith.constant 0 : i32
    return %arg0, %c0_i32 : i32, i32
  }
  func.func @transform_1(%arg0: i32) -> (i32, i32) {
    %c0_i32 = arith.constant 0 : i32
    %c0_i32_0 = arith.constant 0 : i32
    %c0_i32_1 = arith.constant 0 : i32
    return %c0_i32, %c0_i32_0 : i32, i32
  }
  func.func @transform_2(%arg0: i32) -> (i32, i32) {
    %c0_i32 = arith.constant 0 : i32
    %c0_i32_0 = arith.constant 0 : i32
    %c0_i32_1 = arith.constant 0 : i32
    return %c0_i32, %c0_i32_0 : i32, i32
  }
  func.func @transform_3(%arg0: i32) -> (i32, i32) {
    %c0_i32 = arith.constant 0 : i32
    %c0_i32_0 = arith.constant 0 : i32
    return %arg0, %c0_i32 : i32, i32
  }
}

module attributes {stable_mosaic.version = 11 : i64} {
  func.func @_linear_resident_kernel(%arg0: i32, %arg1: memref<128x256xf32, #tpu.memory_space<vmem>>, %arg2: memref<256x256xf32, #tpu.memory_space<vmem>>, %arg3: memref<1x256xf32, #tpu.memory_space<vmem>>, %arg4: memref<128x256xf32, #tpu.memory_space<vmem>>) attributes {dimension_semantics = [#tpu.dimension_semantics<parallel>], iteration_bounds = array<i64: 1>, scalar_prefetch = 0 : i64, scratch_operands = 0 : i64, tpu.core_type = #tpu.core_type<tc>, window_params = [{transform_indices = @transform_0, window_bounds = array<i64: 128, 256>}, {pipeline_mode = #tpu.pipeline_mode<synchronous>, transform_indices = @transform_1, window_bounds = array<i64: 256, 256>}, {pipeline_mode = #tpu.pipeline_mode<synchronous>, transform_indices = @transform_2, window_bounds = array<i64: 1, 256>}, {transform_indices = @transform_3, window_bounds = array<i64: 128, 256>}]} {
    %c0 = arith.constant 0 : index
    %c0_0 = arith.constant 0 : index
    %0 = vector.load %arg1[%c0, %c0_0] : memref<128x256xf32, #tpu.memory_space<vmem>>, vector<128x256xf32>
    %c0_1 = arith.constant 0 : index
    %c0_2 = arith.constant 0 : index
    %1 = vector.load %arg2[%c0_1, %c0_2] : memref<256x256xf32, #tpu.memory_space<vmem>>, vector<256x256xf32>
    %cst = arith.constant dense<0.000000e+00> : vector<128x256xf32>
    %2 = tpu.matmul %0, %1, %cst {dimension_numbers = #tpu.dot_dimension_numbers<[1], [0], [0], [1], [0, 0, 1, 1], [], []>} : vector<128x256xf32>, vector<256x256xf32>, vector<128x256xf32> -> vector<128x256xf32>
    %c0_3 = arith.constant 0 : index
    %c0_4 = arith.constant 0 : index
    %3 = vector.load %arg3[%c0_3, %c0_4] : memref<1x256xf32, #tpu.memory_space<vmem>>, vector<1x256xf32>
    %4 = vector.broadcast %3 : vector<1x256xf32> to vector<128x256xf32>
    %5 = arith.addf %2, %4 : vector<128x256xf32>
    %c0_5 = arith.constant 0 : index
    %c0_6 = arith.constant 0 : index
    %6 = vector.load %arg4[%c0_5, %c0_6] : memref<128x256xf32, #tpu.memory_space<vmem>>, vector<128x256xf32>
    tpu.vector_store %arg4[%c0_5, %c0_6], %5 {strides = array<i32>} : memref<128x256xf32, #tpu.memory_space<vmem>>, vector<128x256xf32>,
    return
  }
  func.func @transform_0(%arg0: i32) -> (i32, i32) {
    %c0_i32 = arith.constant 0 : i32
    %c0_i32_0 = arith.constant 0 : i32
    return %arg0, %c0_i32 : i32, i32
  }
  func.func @transform_1(%arg0: i32) -> (i32, i32) {
    %c0_i32 = arith.constant 0 : i32
    %c0_i32_0 = arith.constant 0 : i32
    %c0_i32_1 = arith.constant 0 : i32
    return %c0_i32, %c0_i32_0 : i32, i32
  }
  func.func @transform_2(%arg0: i32) -> (i32, i32) {
    %c0_i32 = arith.constant 0 : i32
    %c0_i32_0 = arith.constant 0 : i32
    %c0_i32_1 = arith.constant 0 : i32
    return %c0_i32, %c0_i32_0 : i32, i32
  }
  func.func @transform_3(%arg0: i32) -> (i32, i32) {
    %c0_i32 = arith.constant 0 : i32
    %c0_i32_0 = arith.constant 0 : i32
    return %arg0, %c0_i32 : i32, i32
  }
}

</mosaic_0001>

<bundles_post_ra>
// kernel: tpu_custom_call.1
= control target key start
LH: loop header
LB: loop body
LE: loop exit
PB: predicated region body
PF: predicated region fallthrough
CT: control target
= control target key end

     0   :  { %8 = vsyncpa [#allocation3], 0  ;;  %s579_s0 = inlined_call_operand.hbm [shape: f32[128,256], index: 0, kind: input, shape index: {}]   ;;  %s580_s1 = inlined_call_operand.hbm [shape: f32[256,256], index: 1, kind: input, shape index: {}]   ;;  %s581_s2 = inlined_call_operand.vmem [shape: f32[1,256], index: 2, kind: input, shape index: {}]   ;;  %s582_s3 = inlined_call_operand.hbm [shape: f32[128,256], index: 3, kind: output, shape index: {}]  }
   0x1   :  { %9 = vsyncpa [#allocation6], 0 }
   0x2   :  { %10 = vsyncpa [#allocation4], 0  ;;  %s497_s12 = smov [#allocation2]  }
   0x3   :  { %s16_s13 = sshll.u32 %s497_s12, 4  ;;  %s17_s13 = int_to_ptr.vmem [resolvable:$true] %s16_s13 }
   0x4   :  { %s439_s14 = scalar_lea.vmem %s17_s13, 4096  ;;  %p444_p1 = scmp.lt.s32.totalorder %s17_s13, %s17_s13 }
   0x5   :  { %p440_p0 = scmp.ne.s32.totalorder %s17_s13, %s439_s14  ;;  %p445_p2 = scmp.lt.s32.totalorder %s439_s14, %s439_s14 }
   0x7   :  { %p446_p3 = por %p445_p2, %p444_p1 }
   0x9   :  { %p447_p4 = pnand %p446_p3, %p440_p0 }
   0xb   :  { %450 = shalt.err (!%p447_p4)
}
   0xc   :  { %s498_s15 = smov 256   ;;  %s499_s16 = smov 16  }
   0xd   :  { %22 = dma.hbm_to_vmem [thread:$0]  %s579_s0, 4096, %s17_s13, [#allocation3], %s498_s15, %s498_s15, %s499_s16  }
   0xe   :  { %s500_s19 = smov [#allocation5]  }
   0xf   :  { %s28_s20 = sshll.u32 %s500_s19, 4  ;;  %s29_s20 = int_to_ptr.vmem [resolvable:$true] %s28_s20 }
  0x10   :  { %s459_s21 = scalar_lea.vmem %s29_s20, 8192  ;;  %p464_p6 = scmp.lt.s32.totalorder %s29_s20, %s29_s20 }
  0x11   :  { %p460_p5 = scmp.ne.s32.totalorder %s29_s20, %s459_s21  ;;  %p465_p7 = scmp.lt.s32.totalorder %s459_s21, %s459_s21 }
  0x13   :  { %p466_p8 = por %p465_p7, %p464_p6 }
  0x15   :  { %p467_p9 = pnand %p466_p8, %p460_p5 }
  0x17   :  { %470 = shalt.err (!%p467_p9)
}
  0x18   :  { %34 = dma.hbm_to_vmem [thread:$0]  %s580_s1, 8192, %s29_s20, [#allocation6], %s498_s15, %s498_s15, %s499_s16  }
  0x19   :  { %491 = dma.done.wait [#allocation3], 4096  }
  0x1a   :  { %492 = vsyncadd [#allocation3], 4294963200 }
  0x1b   :  { %493 = dma.done.wait [#allocation6], 8192  }
  0x1c   :  { %494 = vsyncadd [#allocation6], 4294959104  ;;  %v106_v0 = vld [vmem:[#allocation5 + $0xf8] sm:$0xff]  ;;  %v105_v1 = vld [vmem:[#allocation5 + $0xf0] sm:$0xff] }
  0x1d   :  { %v104_v2 = vld [vmem:[#allocation5 + $0xe8] sm:$0xff]  ;;  %151 = vmatprep.subr.mxu0 %v106_v0  ;;  %362 = vmatprep.subr.mxu1 %v106_v0  ;;  %v103_v3 = vld [vmem:[#allocation5 + $0xe0] sm:$0xff]  ;;  %v102_v4 = vld [vmem:[#allocation5 + $0xd8] sm:$0xff] }
  0x1e   :  { %152 = vmatpush1.msra.mxu0 %v105_v1  ;;  %394 = vmatpush1.msra.mxu1 %v105_v1  ;;  %v101_v5 = vld [vmem:[#allocation5 + $0xd0] sm:$0xff]  ;;  %v100_v6 = vld [vmem:[#allocation5 + $0xc8] sm:$0xff]  ;;  %v99_v7 = vld [vmem:[#allocation5 + $0xc0] sm:$0xff] }
  0x1f   :  { %153 = vmatprep.subr.mxu0 %v104_v2  ;;  %363 = vmatprep.subr.mxu1 %v104_v2  ;;  %v98_v8 = vld [vmem:[#allocation5 + $0xb8] sm:$0xff]  ;;  %v97_v9 = vld [vmem:[#allocation5 + $0xb0] sm:$0xff]  ;;  %v96_v10 = vld [vmem:[#allocation5 + $0xa8] sm:$0xff] }
  0x20   :  { %154 = vmatpush1.msra.mxu0 %v103_v3  ;;  %395 = vmatpush1.msra.mxu1 %v103_v3  ;;  %v95_v11 = vld [vmem:[#allocation5 + $0xa0] sm:$0xff]  ;;  %v94_v12 = vld [vmem:[#allocation5 + $0x98] sm:$0xff]  ;;  %v93_v13 = vld [vmem:[#allocation5 + $0x90] sm:$0xff] }
  0x21   :  { %155 = vmatprep.subr.mxu0 %v102_v4  ;;  %364 = vmatprep.subr.mxu1 %v102_v4  ;;  %v92_v14 = vld [vmem:[#allocation5 + $0x88] sm:$0xff]  ;;  %v91_v15 = vld [vmem:[#allocation5 + $0x80] sm:$0xff]  ;;  %v90_v16 = vld [vmem:[#allocation5 + $0x78] sm:$0xff] }
  0x22   :  { %156 = vmatpush1.msra.mxu0 %v101_v5  ;;  %396 = vmatpush1.msra.mxu1 %v101_v5  ;;  %v89_v17 = vld [vmem:[#allocation5 + $0x70] sm:$0xff]  ;;  %v88_v18 = vld [vmem:[#allocation5 + $0x68] sm:$0xff]  ;;  %v87_v19 = vld [vmem:[#allocation5 + $0x60] sm:$0xff] }
  0x23   :  { %157 = vmatprep.subr.mxu0 %v100_v6  ;;  %365 = vmatprep.subr.mxu1 %v100_v6  ;;  %v86_v20 = vld [vmem:[#allocation5 + $0x58] sm:$0xff]  ;;  %v85_v21 = vld [vmem:[#allocation5 + $0x50] sm:$0xff]  ;;  %v84_v22 = vld [vmem:[#allocation5 + $0x48] sm:$0xff] }
  0x24   :  { %158 = vmatpush1.msra.mxu0 %v99_v7  ;;  %397 = vmatpush1.msra.mxu1 %v99_v7  ;;  %v83_v23 = vld [vmem:[#allocation5 + $0x40] sm:$0xff]  ;;  %v82_v24 = vld [vmem:[#allocation5 + $0x38] sm:$0xff]  ;;  %v81_v25 = vld [vmem:[#allocation5 + $0x30] sm:$0xff] }
  0x25   :  { %159 = vmatprep.subr.mxu0 %v98_v8  ;;  %366 = vmatprep.subr.mxu1 %v98_v8  ;;  %v80_v26 = vld [vmem:[#allocation5 + $0x28] sm:$0xff]  ;;  %v79_v27 = vld [vmem:[#allocation5 + $0x20] sm:$0xff]  ;;  %v78_v28 = vld [vmem:[#allocation5 + $0x18] sm:$0xff] }
  0x26   :  { %160 = vmatpush1.msra.mxu0 %v97_v9  ;;  %398 = vmatpush1.msra.mxu1 %v97_v9  ;;  %v77_v29 = vld [vmem:[#allocation5 + $0x10] sm:$0xff]  ;;  %v76_v30 = vld [vmem:[#allocation5 + $0x8] sm:$0xff]  ;;  %v75_v31 = vld [vmem:[#allocation5] sm:$0xff] }
  0x27   :  { %161 = vmatprep.subr.mxu0 %v96_v10  ;;  %367 = vmatprep.subr.mxu1 %v96_v10  ;;  %v138_v32 = vld [vmem:[#allocation5 + $0x1f8] sm:$0xff]  ;;  %v137_v33 = vld [vmem:[#allocation5 + $0x1f0] sm:$0xff]  ;;  %v136_v34 = vld [vmem:[#allocation5 + $0x1e8] sm:$0xff] }
  0x28   :  { %162 = vmatpush1.msra.mxu0 %v95_v11  ;;  %399 = vmatpush1.msra.mxu1 %v95_v11  ;;  %v135_v35 = vld [vmem:[#allocation5 + $0x1e0] sm:$0xff]  ;;  %v134_v36 = vld [vmem:[#allocation5 + $0x1d8] sm:$0xff]  ;;  %v133_v37 = vld [vmem:[#allocation5 + $0x1d0] sm:$0xff] }
  0x29   :  { %163 = vmatprep.subr.mxu0 %v94_v12  ;;  %368 = vmatprep.subr.mxu1 %v94_v12  ;;  %v132_v38 = vld [vmem:[#allocation5 + $0x1c8] sm:$0xff]  ;;  %v131_v39 = vld [vmem:[#allocation5 + $0x1c0] sm:$0xff]  ;;  %v130_v40 = vld [vmem:[#allocation5 + $0x1b8] sm:$0xff] }
  0x2a   :  { %164 = vmatpush1.msra.mxu0 %v93_v13  ;;  %400 = vmatpush1.msra.mxu1 %v93_v13  ;;  %v129_v41 = vld [vmem:[#allocation5 + $0x1b0] sm:$0xff]  ;;  %v128_v42 = vld [vmem:[#allocation5 + $0x1a8] sm:$0xff]  ;;  %v127_v43 = vld [vmem:[#allocation5 + $0x1a0] sm:$0xff] }
  0x2b   :  { %165 = vmatprep.subr.mxu0 %v92_v14  ;;  %369 = vmatprep.subr.mxu1 %v92_v14  ;;  %v126_v44 = vld [vmem:[#allocation5 + $0x198] sm:$0xff]  ;;  %v125_v45 = vld [vmem:[#allocation5 + $0x190] sm:$0xff]  ;;  %v124_v46 = vld [vmem:[#allocation5 + $0x188] sm:$0xff] }
  0x2c   :  { %166 = vmatpush1.msra.mxu0 %v91_v15  ;;  %401 = vmatpush1.msra.mxu1 %v91_v15  ;;  %v123_v47 = vld [vmem:[#allocation5 + $0x180] sm:$0xff]  ;;  %v122_v48 = vld [vmem:[#allocation5 + $0x178] sm:$0xff]  ;;  %v121_v49 = vld [vmem:[#allocation5 + $0x170] sm:$0xff] }
  0x2d   :  { %167 = vmatprep.subr.mxu0 %v90_v16  ;;  %370 = vmatprep.subr.mxu1 %v90_v16  ;;  %v120_v50 = vld [vmem:[#allocation5 + $0x168] sm:$0xff]  ;;  %v119_v51 = vld [vmem:[#allocation5 + $0x160] sm:$0xff]  ;;  %v118_v52 = vld [vmem:[#allocation5 + $0x158] sm:$0xff] }
  0x2e   :  { %168 = vmatpush1.msra.mxu0 %v89_v17  ;;  %402 = vmatpush1.msra.mxu1 %v89_v17  ;;  %v117_v53 = vld [vmem:[#allocation5 + $0x150] sm:$0xff]  ;;  %v116_v54 = vld [vmem:[#allocation5 + $0x148] sm:$0xff]  ;;  %v115_v55 = vld [vmem:[#allocation5 + $0x140] sm:$0xff] }
  0x2f   :  { %169 = vmatprep.subr.mxu0 %v88_v18  ;;  %371 = vmatprep.subr.mxu1 %v88_v18  ;;  %v114_v56 = vld [vmem:[#allocation5 + $0x138] sm:$0xff]  ;;  %v113_v57 = vld [vmem:[#allocation5 + $0x130] sm:$0xff]  ;;  %v112_v58 = vld [vmem:[#allocation5 + $0x128] sm:$0xff] }
  0x30   :  { %170 = vmatpush1.msra.mxu0 %v87_v19  ;;  %403 = vmatpush1.msra.mxu1 %v87_v19  ;;  %v111_v59 = vld [vmem:[#allocation5 + $0x120] sm:$0xff]  ;;  %v110_v60 = vld [vmem:[#allocation5 + $0x118] sm:$0xff]  ;;  %v109_v61 = vld [vmem:[#allocation5 + $0x110] sm:$0xff] }
  0x31   :  { %171 = vmatprep.subr.mxu0 %v86_v20  ;;  %372 = vmatprep.subr.mxu1 %v86_v20  ;;  %v108_v62 = vld [vmem:[#allocation5 + $0x108] sm:$0xff]  ;;  %v107_v63 = vld [vmem:[#allocation5 + $0x100] sm:$0xff]  ;;  %v46_v4 = vld [vmem:[#allocation2 + $0x18] sm:$0xff] }
  0x32   :  { %172 = vmatpush1.msra.mxu0 %v85_v21  ;;  %404 = vmatpush1.msra.mxu1 %v85_v21  ;;  %v44_v0 = vld [vmem:[#allocation2 + $0x8] sm:$0xff]  ;;  %v43_v2 = vld [vmem:[#allocation2] sm:$0xff]  ;;  %v62_v5 = vld [vmem:[#allocation2 + $0x98] sm:$0xff] }
  0x33   :  { %173 = vmatprep.subr.mxu0 %v84_v22  ;;  %373 = vmatprep.subr.mxu1 %v84_v22  ;;  %v60_v1 = vld [vmem:[#allocation2 + $0x88] sm:$0xff]  ;;  %v59_v3 = vld [vmem:[#allocation2 + $0x80] sm:$0xff]  ;;  %v45_v6 = vld [vmem:[#allocation2 + $0x10] sm:$0xff] }
  0x34   :  { %174 = vmatpush1.msra.mxu0 %v83_v23  ;;  %405 = vmatpush1.msra.mxu1 %v83_v23  ;;  %v61_v7 = vld [vmem:[#allocation2 + $0x90] sm:$0xff]  ;;  %v48_v8 = vld [vmem:[#allocation2 + $0x28] sm:$0xff]  ;;  %v47_v10 = vld [vmem:[#allocation2 + $0x20] sm:$0xff] }
  0x35   :  { %175 = vmatprep.subr.mxu0 %v82_v24  ;;  %374 = vmatprep.subr.mxu1 %v82_v24  ;;  %v64_v9 = vld [vmem:[#allocation2 + $0xa8] sm:$0xff]  ;;  %v63_v11 = vld [vmem:[#allocation2 + $0xa0] sm:$0xff]  ;;  %v50_v12 = vld [vmem:[#allocation2 + $0x38] sm:$0xff] }
  0x36   :  { %176 = vmatpush1.msra.mxu0 %v81_v25  ;;  %406 = vmatpush1.msra.mxu1 %v81_v25  ;;  %v66_v13 = vld [vmem:[#allocation2 + $0xb8] sm:$0xff]  ;;  %v49_v14 = vld [vmem:[#allocation2 + $0x30] sm:$0xff]  ;;  %v52_v16 = vld [vmem:[#allocation2 + $0x48] sm:$0xff] }
  0x37   :  { %177 = vmatprep.subr.mxu0 %v80_v26  ;;  %375 = vmatprep.subr.mxu1 %v80_v26  ;;  %v65_v15 = vld [vmem:[#allocation2 + $0xb0] sm:$0xff]  ;;  %v68_v17 = vld [vmem:[#allocation2 + $0xc8] sm:$0xff]  ;;  %v51_v18 = vld [vmem:[#allocation2 + $0x40] sm:$0xff] }
  0x38   :  { %178 = vmatpush1.msra.mxu0 %v79_v27  ;;  %407 = vmatpush1.msra.mxu1 %v79_v27  ;;  %v67_v19 = vld [vmem:[#allocation2 + $0xc0] sm:$0xff]  ;;  %v54_v20 = vld [vmem:[#allocation2 + $0x58] sm:$0xff]  ;;  %v53_v22 = vld [vmem:[#allocation2 + $0x50] sm:$0xff] }
  0x39   :  { %179 = vmatprep.subr.mxu0 %v78_v28  ;;  %376 = vmatprep.subr.mxu1 %v78_v28  ;;  %v70_v21 = vld [vmem:[#allocation2 + $0xd8] sm:$0xff]  ;;  %v69_v23 = vld [vmem:[#allocation2 + $0xd0] sm:$0xff]  ;;  %v56_v24 = vld [vmem:[#allocation2 + $0x68] sm:$0xff] }
  0x3a   :  { %180 = vmatpush1.msra.mxu0 %v77_v29  ;;  %408 = vmatpush1.msra.mxu1 %v77_v29  ;;  %v72_v25 = vld [vmem:[#allocation2 + $0xe8] sm:$0xff]  ;;  %v55_v26 = vld [vmem:[#allocation2 + $0x60] sm:$0xff]  ;;  %v58_v28 = vld [vmem:[#allocation2 + $0x78] sm:$0xff] }
  0x3b   :  { %181 = vmatprep.subr.mxu0 %v76_v30  ;;  %377 = vmatprep.subr.mxu1 %v76_v30  ;;  %v71_v27 = vld [vmem:[#allocation2 + $0xe0] sm:$0xff]  ;;  %v74_v29 = vld [vmem:[#allocation2 + $0xf8] sm:$0xff]  ;;  %v57_v30 = vld [vmem:[#allocation2 + $0x70] sm:$0xff] }
  0x3c   :  { %182 = vmatpush1.msra.mxu0 %v75_v31  ;;  %409 = vmatpush1.msra.mxu1 %v75_v31  ;;  %v73_v31 = vld [vmem:[#allocation2 + $0xf0] sm:$0xff] }
  0x3d   :  { %183 = vmatprep.subr.mxu0 %v138_v32  ;;  %378 = vmatprep.subr.mxu1 %v138_v32  ;;  %v141_v32 = vlaneseq }
  0x3e   :  { %184 = vmatpush2.msra.mxu0 %v137_v33  ;;  %410 = vmatpush2.msra.mxu1 %v137_v33 }
  0x3f   :  { %185 = vmatprep.subr.mxu0 %v136_v34  ;;  %379 = vmatprep.subr.mxu1 %v136_v34  ;;  %v142_v33 = vshrl.u32 %v141_v32, 7 }
  0x40   :  { %186 = vmatpush2.msra.mxu0 %v135_v35  ;;  %411 = vmatpush2.msra.mxu1 %v135_v35  ;;  %v139_v35 = vld [vmem:[%s581_s2] sm:$0x3]  ;;  %s501_s2 = smov [#allocation7]  }
  0x41   :  { %187 = vmatprep.subr.mxu0 %v134_v36  ;;  %380 = vmatprep.subr.mxu1 %v134_v36  ;;  %v143_v34 = vsub.s32 0, %v142_v33  ;;  %v147_v36 = vsub.s32 1, %v142_v33  ;;  %s349_s24 = sshll.u32 %s501_s2, 4  ;;  %s350_s24 = int_to_ptr.vmem [resolvable:$true] %s349_s24 }
  0x42   :  { %188 = vmatpush2.msra.mxu0 %v133_v37  ;;  %412 = vmatpush2.msra.mxu1 %v133_v37  ;;  %s471_s25 = scalar_lea.vmem %s350_s24, 4096  ;;  %p476_p11 = scmp.lt.s32.totalorder %s350_s24, %s350_s24 }
  0x43   :  { %189 = vmatprep.subr.mxu0 %v132_v38  ;;  %381 = vmatprep.subr.mxu1 %v132_v38  ;;  %v537_v37 = vrot.slane %v139_v35, %v143_v34  ;;  %v539_v38 = vrot.slane %v139_v35, %v147_v36  ;;  %p472_p10 = scmp.ne.s32.totalorder %s350_s24, %s471_s25  ;;  %p477_p12 = scmp.lt.s32.totalorder %s471_s25, %s471_s25 }
  0x44   :  { %190 = vmatpush2.msra.mxu0 %v131_v39  ;;  %413 = vmatpush2.msra.mxu1 %v131_v39 }
  0x45   :  { %191 = vmatprep.subr.mxu0 %v130_v40  ;;  %382 = vmatprep.subr.mxu1 %v130_v40  ;;  %p478_p13 = por %p477_p12, %p476_p11 }
  0x46   :  { %192 = vmatpush2.msra.mxu0 %v129_v41  ;;  %414 = vmatpush2.msra.mxu1 %v129_v41 }
  0x47   :  { %193 = vmatprep.subr.mxu0 %v128_v42  ;;  %383 = vmatprep.subr.mxu1 %v128_v42  ;;  %p479_p0 = pnand %p478_p13, %p472_p10 }
  0x48   :  { %194 = vmatpush2.msra.mxu0 %v127_v43  ;;  %415 = vmatpush2.msra.mxu1 %v127_v43 }
  0x49   :  { %195 = vmatprep.subr.mxu0 %v126_v44  ;;  %384 = vmatprep.subr.mxu1 %v126_v44 }
  0x4a   :  { %196 = vmatpush2.msra.mxu0 %v125_v45  ;;  %416 = vmatpush2.msra.mxu1 %v125_v45 }
  0x4b   :  { %197 = vmatprep.subr.mxu0 %v124_v46  ;;  %385 = vmatprep.subr.mxu1 %v124_v46 }
  0x4c   :  { %198 = vmatpush2.msra.mxu0 %v123_v47  ;;  %417 = vmatpush2.msra.mxu1 %v123_v47 }
  0x4d   :  { %199 = vmatprep.subr.mxu0 %v122_v48  ;;  %386 = vmatprep.subr.mxu1 %v122_v48 }
  0x4e   :  { %200 = vmatpush2.msra.mxu0 %v121_v49  ;;  %418 = vmatpush2.msra.mxu1 %v121_v49 }
  0x4f   :  { %201 = vmatprep.subr.mxu0 %v120_v50  ;;  %387 = vmatprep.subr.mxu1 %v120_v50 }
  0x50   :  { %202 = vmatpush2.msra.mxu0 %v119_v51  ;;  %419 = vmatpush2.msra.mxu1 %v119_v51 }
  0x51   :  { %203 = vmatprep.subr.mxu0 %v118_v52  ;;  %388 = vmatprep.subr.mxu1 %v118_v52 }
  0x52   :  { %204 = vmatpush2.msra.mxu0 %v117_v53  ;;  %420 = vmatpush2.msra.mxu1 %v117_v53 }
  0x53   :  { %205 = vmatprep.subr.mxu0 %v116_v54  ;;  %389 = vmatprep.subr.mxu1 %v116_v54 }
  0x54   :  { %206 = vmatpush2.msra.mxu0 %v115_v55  ;;  %421 = vmatpush2.msra.mxu1 %v115_v55 }
  0x55   :  { %207 = vmatprep.subr.mxu0 %v114_v56  ;;  %390 = vmatprep.subr.mxu1 %v114_v56 }
  0x56   :  { %208 = vmatpush2.msra.mxu0 %v113_v57  ;;  %422 = vmatpush2.msra.mxu1 %v113_v57 }
  0x57   :  { %209 = vmatprep.subr.mxu0 %v112_v58  ;;  %391 = vmatprep.subr.mxu1 %v112_v58 }
  0x58   :  { %210 = vmatpush2.msra.mxu0 %v111_v59  ;;  %423 = vmatpush2.msra.mxu1 %v111_v59 }
  0x59   :  { %211 = vmatprep.subr.mxu0 %v110_v60  ;;  %392 = vmatprep.subr.mxu1 %v110_v60 }
  0x5a   :  { %212 = vmatpush2.msra.mxu0 %v109_v61  ;;  %424 = vmatpush2.msra.mxu1 %v109_v61 }
  0x5b   :  { %213 = vmatprep.subr.mxu0 %v108_v62  ;;  %393 = vmatprep.subr.mxu1 %v108_v62 }
  0x5c   :  { %214 = vmatpush2.msra.mxu0 %v107_v63  ;;  %425 = vmatpush2.msra.mxu1 %v107_v63 }
  0x5d   :  { %215 = vmatprep.mubr.f32.mxu0 %v44_v0  ;;  %263 = vmatprep.mubr.f32.mxu1 %v60_v1 }
  0x5e   :  { %216 = vmatmul.mubr.f32.vlgmr.msra.gmra.mxu0 %v43_v2  ;;  %264 = vmatmul.mubr.f32.vlgmr.msra.gmra.mxu1 %v59_v3 }
  0x5f   :  { %221 = vmatprep.mubr.f32.mxu0 %v46_v4  ;;  %269 = vmatprep.mubr.f32.mxu1 %v62_v5 }
  0x62   :  { %222 = vmatmul.mubr.f32.gmra.mxu0 %v45_v6  ;;  %270 = vmatmul.mubr.f32.gmra.mxu1 %v61_v7 }
  0x63   :  { %227 = vmatprep.mubr.f32.mxu0 %v48_v8  ;;  %275 = vmatprep.mubr.f32.mxu1 %v64_v9 }
  0x66   :  { %228 = vmatmul.mubr.f32.gmra.mxu0 %v47_v10  ;;  %276 = vmatmul.mubr.f32.gmra.mxu1 %v63_v11 }
  0x67   :  { %233 = vmatprep.mubr.f32.mxu0 %v50_v12  ;;  %281 = vmatprep.mubr.f32.mxu1 %v66_v13 }
  0x6a   :  { %234 = vmatmul.mubr.f32.gmra.mxu0 %v49_v14  ;;  %282 = vmatmul.mubr.f32.gmra.mxu1 %v65_v15 }
  0x6b   :  { %239 = vmatprep.mubr.f32.mxu0 %v52_v16  ;;  %287 = vmatprep.mubr.f32.mxu1 %v68_v17 }
  0x6e   :  { %240 = vmatmul.mubr.f32.gmra.mxu0 %v51_v18  ;;  %288 = vmatmul.mubr.f32.gmra.mxu1 %v67_v19 }
  0x6f   :  { %245 = vmatprep.mubr.f32.mxu0 %v54_v20  ;;  %293 = vmatprep.mubr.f32.mxu1 %v70_v21 }
  0x72   :  { %246 = vmatmul.mubr.f32.gmra.mxu0 %v53_v22  ;;  %294 = vmatmul.mubr.f32.gmra.mxu1 %v69_v23 }
  0x73   :  { %251 = vmatprep.mubr.f32.mxu0 %v56_v24  ;;  %299 = vmatprep.mubr.f32.mxu1 %v72_v25 }
  0x76   :  { %252 = vmatmul.mubr.f32.gmra.mxu0 %v55_v26  ;;  %300 = vmatmul.mubr.f32.gmra.mxu1 %v71_v27 }
  0x77   :  { %257 = vmatprep.mubr.f32.mxu0 %v58_v28  ;;  %305 = vmatprep.mubr.f32.mxu1 %v74_v29 }
  0x7a   :  { %258 = vmatmul.mubr.f32.gmra.mxu0 %v57_v30  ;;  %306 = vmatmul.mubr.f32.gmra.mxu1 %v73_v31 }
 0x11e   :  { %v217_v39 = vpop.f32.mrf.mxu0  ;;  %v265_v40 = vpop.f32.mrf.mxu1 }
 0x11f   :  { %v218_v41 = vadd.f32 %v217_v39, %v537_v37  ;;  %v266_v42 = vadd.f32 %v265_v40, %v537_v37 }
 0x120   :  { %v219_v43 = vpop.f32.mrf.mxu0  ;;  %v267_v44 = vpop.f32.mrf.mxu1 }
 0x121   :  { %312 = vst [vmem:[#allocation7] sm:$0xff] %v218_v41  ;;  %328 = vst [vmem:[#allocation7 + $0x80] sm:$0xff] %v266_v42  ;;  %v220_v45 = vadd.f32 %v219_v43, %v539_v38  ;;  %v268_v46 = vadd.f32 %v267_v44, %v539_v38 }
 0x122   :  { %v223_v47 = vpop.f32.mrf.mxu0  ;;  %v271_v48 = vpop.f32.mrf.mxu1 }
 0x123   :  { %313 = vst [vmem:[#allocation7 + $0x8] sm:$0xff] %v220_v45  ;;  %329 = vst [vmem:[#allocation7 + $0x88] sm:$0xff] %v268_v46  ;;  %v224_v49 = vadd.f32 %v223_v47, %v537_v37  ;;  %v272_v50 = vadd.f32 %v271_v48, %v537_v37 }
 0x124   :  { %v225_v51 = vpop.f32.mrf.mxu0  ;;  %v273_v52 = vpop.f32.mrf.mxu1 }
 0x125   :  { %314 = vst [vmem:[#allocation7 + $0x10] sm:$0xff] %v224_v49  ;;  %330 = vst [vmem:[#allocation7 + $0x90] sm:$0xff] %v272_v50  ;;  %v226_v53 = vadd.f32 %v225_v51, %v539_v38  ;;  %v274_v54 = vadd.f32 %v273_v52, %v539_v38 }
 0x126   :  { %v229_v55 = vpop.f32.mrf.mxu0  ;;  %v277_v56 = vpop.f32.mrf.mxu1 }
 0x127   :  { %315 = vst [vmem:[#allocation7 + $0x18] sm:$0xff] %v226_v53  ;;  %331 = vst [vmem:[#allocation7 + $0x98] sm:$0xff] %v274_v54  ;;  %v230_v57 = vadd.f32 %v229_v55, %v537_v37  ;;  %v278_v58 = vadd.f32 %v277_v56, %v537_v37 }
 0x128   :  { %v231_v59 = vpop.f32.mrf.mxu0  ;;  %v279_v60 = vpop.f32.mrf.mxu1 }
 0x129   :  { %316 = vst [vmem:[#allocation7 + $0x20] sm:$0xff] %v230_v57  ;;  %332 = vst [vmem:[#allocation7 + $0xa0] sm:$0xff] %v278_v58  ;;  %v232_v61 = vadd.f32 %v231_v59, %v539_v38  ;;  %v280_v62 = vadd.f32 %v279_v60, %v539_v38 }
 0x12a   :  { %v235_v63 = vpop.f32.mrf.mxu0  ;;  %v283_v0 = vpop.f32.mrf.mxu1 }
 0x12b   :  { %317 = vst [vmem:[#allocation7 + $0x28] sm:$0xff] %v232_v61  ;;  %333 = vst [vmem:[#allocation7 + $0xa8] sm:$0xff] %v280_v62  ;;  %v236_v1 = vadd.f32 %v235_v63, %v537_v37  ;;  %v284_v2 = vadd.f32 %v283_v0, %v537_v37 }
 0x12c   :  { %v237_v3 = vpop.f32.mrf.mxu0  ;;  %v285_v4 = vpop.f32.mrf.mxu1 }
 0x12d   :  { %318 = vst [vmem:[#allocation7 + $0x30] sm:$0xff] %v236_v1  ;;  %334 = vst [vmem:[#allocation7 + $0xb0] sm:$0xff] %v284_v2  ;;  %v238_v5 = vadd.f32 %v237_v3, %v539_v38  ;;  %v286_v6 = vadd.f32 %v285_v4, %v539_v38 }
 0x12e   :  { %v241_v7 = vpop.f32.mrf.mxu0  ;;  %v289_v8 = vpop.f32.mrf.mxu1 }
 0x12f   :  { %319 = vst [vmem:[#allocation7 + $0x38] sm:$0xff] %v238_v5  ;;  %335 = vst [vmem:[#allocation7 + $0xb8] sm:$0xff] %v286_v6  ;;  %v242_v9 = vadd.f32 %v241_v7, %v537_v37  ;;  %v290_v10 = vadd.f32 %v289_v8, %v537_v37 }
 0x130   :  { %v243_v11 = vpop.f32.mrf.mxu0  ;;  %v291_v12 = vpop.f32.mrf.mxu1 }
 0x131   :  { %320 = vst [vmem:[#allocation7 + $0x40] sm:$0xff] %v242_v9  ;;  %336 = vst [vmem:[#allocation7 + $0xc0] sm:$0xff] %v290_v10  ;;  %v244_v13 = vadd.f32 %v243_v11, %v539_v38  ;;  %v292_v14 = vadd.f32 %v291_v12, %v539_v38 }
 0x132   :  { %v247_v15 = vpop.f32.mrf.mxu0  ;;  %v295_v16 = vpop.f32.mrf.mxu1 }
 0x133   :  { %321 = vst [vmem:[#allocation7 + $0x48] sm:$0xff] %v244_v13  ;;  %337 = vst [vmem:[#allocation7 + $0xc8] sm:$0xff] %v292_v14  ;;  %v248_v17 = vadd.f32 %v247_v15, %v537_v37  ;;  %v296_v18 = vadd.f32 %v295_v16, %v537_v37 }
 0x134   :  { %v249_v19 = vpop.f32.mrf.mxu0  ;;  %v297_v20 = vpop.f32.mrf.mxu1 }
 0x135   :  { %322 = vst [vmem:[#allocation7 + $0x50] sm:$0xff] %v248_v17  ;;  %338 = vst [vmem:[#allocation7 + $0xd0] sm:$0xff] %v296_v18  ;;  %v250_v21 = vadd.f32 %v249_v19, %v539_v38  ;;  %v298_v22 = vadd.f32 %v297_v20, %v539_v38 }
 0x136   :  { %v253_v23 = vpop.f32.mrf.mxu0  ;;  %v301_v24 = vpop.f32.mrf.mxu1 }
 0x137   :  { %323 = vst [vmem:[#allocation7 + $0x58] sm:$0xff] %v250_v21  ;;  %339 = vst [vmem:[#allocation7 + $0xd8] sm:$0xff] %v298_v22  ;;  %v254_v25 = vadd.f32 %v253_v23, %v537_v37  ;;  %v302_v26 = vadd.f32 %v301_v24, %v537_v37 }
 0x138   :  { %v255_v27 = vpop.f32.mrf.mxu0  ;;  %v303_v28 = vpop.f32.mrf.mxu1 }
 0x139   :  { %324 = vst [vmem:[#allocation7 + $0x60] sm:$0xff] %v254_v25  ;;  %340 = vst [vmem:[#allocation7 + $0xe0] sm:$0xff] %v302_v26  ;;  %v256_v29 = vadd.f32 %v255_v27, %v539_v38  ;;  %v304_v30 = vadd.f32 %v303_v28, %v539_v38 }
 0x13a   :  { %v259_v31 = vpop.f32.mrf.mxu0  ;;  %v307_v32 = vpop.f32.mrf.mxu1 }
 0x13b   :  { %325 = vst [vmem:[#allocation7 + $0x68] sm:$0xff] %v256_v29  ;;  %341 = vst [vmem:[#allocation7 + $0xe8] sm:$0xff] %v304_v30  ;;  %v260_v33 = vadd.f32 %v259_v31, %v537_v37  ;;  %v308_v34 = vadd.f32 %v307_v32, %v537_v37 }
 0x13c   :  { %v261_v35 = vpop.f32.mrf.mxu0  ;;  %v309_v36 = vpop.f32.mrf.mxu1 }
 0x13d   :  { %326 = vst [vmem:[#allocation7 + $0x70] sm:$0xff] %v260_v33  ;;  %342 = vst [vmem:[#allocation7 + $0xf0] sm:$0xff] %v308_v34  ;;  %v262_v39 = vadd.f32 %v261_v35, %v539_v38  ;;  %v310_v40 = vadd.f32 %v309_v36, %v539_v38 }
 0x13f   :  { %327 = vst [vmem:[#allocation7 + $0x78] sm:$0xff] %v262_v39  ;;  %343 = vst [vmem:[#allocation7 + $0xf8] sm:$0xff] %v310_v40 }
 0x140   :  { %482 = shalt.err (!%p479_p0)
}
 0x141   :  { %355 = dma.vmem_to_hbm [thread:$0]  %s350_s24, 4096, %s582_s3, [#allocation4], %s498_s15, %s498_s15, %s499_s16  }
 0x142   :  { %495 = dma.done.wait [#allocation4], 4096  }
 0x143   :  { %496 = vsyncadd [#allocation4], 4294963200 }
 0x144   :  { %359 = vsyncpa [#allocation3], 1 }
 0x145   :  { %360 = vsyncpa [#allocation6], 1 }
 0x146   :  { %361 = vsyncpa [#allocation4], 1 }

// kernel: tpu_custom_call.1
= control target key start
LH: loop header
LB: loop body
LE: loop exit
PB: predicated region body
PF: predicated region fallthrough
CT: control target
= control target key end

     0   :  { %8 = vsyncpa [#allocation3], 0  ;;  %s579_s0 = inlined_call_operand.hbm [shape: f32[128,256], index: 0, kind: input, shape index: {}]   ;;  %s580_s1 = inlined_call_operand.hbm [shape: f32[256,256], index: 1, kind: input, shape index: {}]   ;;  %s581_s2 = inlined_call_operand.vmem [shape: f32[1,256], index: 2, kind: input, shape index: {}]   ;;  %s582_s3 = inlined_call_operand.hbm [shape: f32[128,256], index: 3, kind: output, shape index: {}]  }
   0x1   :  { %9 = vsyncpa [#allocation6], 0 }
   0x2   :  { %10 = vsyncpa [#allocation4], 0  ;;  %s497_s12 = smov [#allocation2]  }
   0x3   :  { %s16_s13 = sshll.u32 %s497_s12, 4  ;;  %s17_s13 = int_to_ptr.vmem [resolvable:$true] %s16_s13 }
   0x4   :  { %s439_s14 = scalar_lea.vmem %s17_s13, 4096  ;;  %p444_p1 = scmp.lt.s32.totalorder %s17_s13, %s17_s13 }
   0x5   :  { %p440_p0 = scmp.ne.s32.totalorder %s17_s13, %s439_s14  ;;  %p445_p2 = scmp.lt.s32.totalorder %s439_s14, %s439_s14 }
   0x7   :  { %p446_p3 = por %p445_p2, %p444_p1 }
   0x9   :  { %p447_p4 = pnand %p446_p3, %p440_p0 }
   0xb   :  { %450 = shalt.err (!%p447_p4)
}
   0xc   :  { %s498_s15 = smov 256   ;;  %s499_s16 = smov 16  }
   0xd   :  { %22 = dma.hbm_to_vmem [thread:$0]  %s579_s0, 4096, %s17_s13, [#allocation3], %s498_s15, %s498_s15, %s499_s16  }
   0xe   :  { %s500_s19 = smov [#allocation5]  }
   0xf   :  { %s28_s20 = sshll.u32 %s500_s19, 4  ;;  %s29_s20 = int_to_ptr.vmem [resolvable:$true] %s28_s20 }
  0x10   :  { %s459_s21 = scalar_lea.vmem %s29_s20, 8192  ;;  %p464_p6 = scmp.lt.s32.totalorder %s29_s20, %s29_s20 }
  0x11   :  { %p460_p5 = scmp.ne.s32.totalorder %s29_s20, %s459_s21  ;;  %p465_p7 = scmp.lt.s32.totalorder %s459_s21, %s459_s21 }
  0x13   :  { %p466_p8 = por %p465_p7, %p464_p6 }
  0x15   :  { %p467_p9 = pnand %p466_p8, %p460_p5 }
  0x17   :  { %470 = shalt.err (!%p467_p9)
}
  0x18   :  { %34 = dma.hbm_to_vmem [thread:$0]  %s580_s1, 8192, %s29_s20, [#allocation6], %s498_s15, %s498_s15, %s499_s16  }
  0x19   :  { %491 = dma.done.wait [#allocation3], 4096  }
  0x1a   :  { %492 = vsyncadd [#allocation3], 4294963200 }
  0x1b   :  { %493 = dma.done.wait [#allocation6], 8192  }
  0x1c   :  { %494 = vsyncadd [#allocation6], 4294959104  ;;  %v106_v0 = vld [vmem:[#allocation5 + $0xf8] sm:$0xff]  ;;  %v105_v1 = vld [vmem:[#allocation5 + $0xf0] sm:$0xff] }
  0x1d   :  { %v104_v2 = vld [vmem:[#allocation5 + $0xe8] sm:$0xff]  ;;  %151 = vmatprep.subr.mxu0 %v106_v0  ;;  %362 = vmatprep.subr.mxu1 %v106_v0  ;;  %v103_v3 = vld [vmem:[#allocation5 + $0xe0] sm:$0xff]  ;;  %v102_v4 = vld [vmem:[#allocation5 + $0xd8] sm:$0xff] }
  0x1e   :  { %152 = vmatpush1.msra.mxu0 %v105_v1  ;;  %394 = vmatpush1.msra.mxu1 %v105_v1  ;;  %v101_v5 = vld [vmem:[#allocation5 + $0xd0] sm:$0xff]  ;;  %v100_v6 = vld [vmem:[#allocation5 + $0xc8] sm:$0xff]  ;;  %v99_v7 = vld [vmem:[#allocation5 + $0xc0] sm:$0xff] }
  0x1f   :  { %153 = vmatprep.subr.mxu0 %v104_v2  ;;  %363 = vmatprep.subr.mxu1 %v104_v2  ;;  %v98_v8 = vld [vmem:[#allocation5 + $0xb8] sm:$0xff]  ;;  %v97_v9 = vld [vmem:[#allocation5 + $0xb0] sm:$0xff]  ;;  %v96_v10 = vld [vmem:[#allocation5 + $0xa8] sm:$0xff] }
  0x20   :  { %154 = vmatpush1.msra.mxu0 %v103_v3  ;;  %395 = vmatpush1.msra.mxu1 %v103_v3  ;;  %v95_v11 = vld [vmem:[#allocation5 + $0xa0] sm:$0xff]  ;;  %v94_v12 = vld [vmem:[#allocation5 + $0x98] sm:$0xff]  ;;  %v93_v13 = vld [vmem:[#allocation5 + $0x90] sm:$0xff] }
  0x21   :  { %155 = vmatprep.subr.mxu0 %v102_v4  ;;  %364 = vmatprep.subr.mxu1 %v102_v4  ;;  %v92_v14 = vld [vmem:[#allocation5 + $0x88] sm:$0xff]  ;;  %v91_v15 = vld [vmem:[#allocation5 + $0x80] sm:$0xff]  ;;  %v90_v16 = vld [vmem:[#allocation5 + $0x78] sm:$0xff] }
  0x22   :  { %156 = vmatpush1.msra.mxu0 %v101_v5  ;;  %396 = vmatpush1.msra.mxu1 %v101_v5  ;;  %v89_v17 = vld [vmem:[#allocation5 + $0x70] sm:$0xff]  ;;  %v88_v18 = vld [vmem:[#allocation5 + $0x68] sm:$0xff]  ;;  %v87_v19 = vld [vmem:[#allocation5 + $0x60] sm:$0xff] }
  0x23   :  { %157 = vmatprep.subr.mxu0 %v100_v6  ;;  %365 = vmatprep.subr.mxu1 %v100_v6  ;;  %v86_v20 = vld [vmem:[#allocation5 + $0x58] sm:$0xff]  ;;  %v85_v21 = vld [vmem:[#allocation5 + $0x50] sm:$0xff]  ;;  %v84_v22 = vld [vmem:[#allocation5 + $0x48] sm:$0xff] }
  0x24   :  { %158 = vmatpush1.msra.mxu0 %v99_v7  ;;  %397 = vmatpush1.msra.mxu1 %v99_v7  ;;  %v83_v23 = vld [vmem:[#allocation5 + $0x40] sm:$0xff]  ;;  %v82_v24 = vld [vmem:[#allocation5 + $0x38] sm:$0xff]  ;;  %v81_v25 = vld [vmem:[#allocation5 + $0x30] sm:$0xff] }
  0x25   :  { %159 = vmatprep.subr.mxu0 %v98_v8  ;;  %366 = vmatprep.subr.mxu1 %v98_v8  ;;  %v80_v26 = vld [vmem:[#allocation5 + $0x28] sm:$0xff]  ;;  %v79_v27 = vld [vmem:[#allocation5 + $0x20] sm:$0xff]  ;;  %v78_v28 = vld [vmem:[#allocation5 + $0x18] sm:$0xff] }
  0x26   :  { %160 = vmatpush1.msra.mxu0 %v97_v9  ;;  %398 = vmatpush1.msra.mxu1 %v97_v9  ;;  %v77_v29 = vld [vmem:[#allocation5 + $0x10] sm:$0xff]  ;;  %v76_v30 = vld [vmem:[#allocation5 + $0x8] sm:$0xff]  ;;  %v75_v31 = vld [vmem:[#allocation5] sm:$0xff] }
  0x27   :  { %161 = vmatprep.subr.mxu0 %v96_v10  ;;  %367 = vmatprep.subr.mxu1 %v96_v10  ;;  %v138_v32 = vld [vmem:[#allocation5 + $0x1f8] sm:$0xff]  ;;  %v137_v33 = vld [vmem:[#allocation5 + $0x1f0] sm:$0xff]  ;;  %v136_v34 = vld [vmem:[#allocation5 + $0x1e8] sm:$0xff] }
  0x28   :  { %162 = vmatpush1.msra.mxu0 %v95_v11  ;;  %399 = vmatpush1.msra.mxu1 %v95_v11  ;;  %v135_v35 = vld [vmem:[#allocation5 + $0x1e0] sm:$0xff]  ;;  %v134_v36 = vld [vmem:[#allocation5 + $0x1d8] sm:$0xff]  ;;  %v133_v37 = vld [vmem:[#allocation5 + $0x1d0] sm:$0xff] }
  0x29   :  { %163 = vmatprep.subr.mxu0 %v94_v12  ;;  %368 = vmatprep.subr.mxu1 %v94_v12  ;;  %v132_v38 = vld [vmem:[#allocation5 + $0x1c8] sm:$0xff]  ;;  %v131_v39 = vld [vmem:[#allocation5 + $0x1c0] sm:$0xff]  ;;  %v130_v40 = vld [vmem:[#allocation5 + $0x1b8] sm:$0xff] }
  0x2a   :  { %164 = vmatpush1.msra.mxu0 %v93_v13  ;;  %400 = vmatpush1.msra.mxu1 %v93_v13  ;;  %v129_v41 = vld [vmem:[#allocation5 + $0x1b0] sm:$0xff]  ;;  %v128_v42 = vld [vmem:[#allocation5 + $0x1a8] sm:$0xff]  ;;  %v127_v43 = vld [vmem:[#allocation5 + $0x1a0] sm:$0xff] }
  0x2b   :  { %165 = vmatprep.subr.mxu0 %v92_v14  ;;  %369 = vmatprep.subr.mxu1 %v92_v14  ;;  %v126_v44 = vld [vmem:[#allocation5 + $0x198] sm:$0xff]  ;;  %v125_v45 = vld [vmem:[#allocation5 + $0x190] sm:$0xff]  ;;  %v124_v46 = vld [vmem:[#allocation5 + $0x188] sm:$0xff] }
  0x2c   :  { %166 = vmatpush1.msra.mxu0 %v91_v15  ;;  %401 = vmatpush1.msra.mxu1 %v91_v15  ;;  %v123_v47 = vld [vmem:[#allocation5 + $0x180] sm:$0xff]  ;;  %v122_v48 = vld [vmem:[#allocation5 + $0x178] sm:$0xff]  ;;  %v121_v49 = vld [vmem:[#allocation5 + $0x170] sm:$0xff] }
  0x2d   :  { %167 = vmatprep.subr.mxu0 %v90_v16  ;;  %370 = vmatprep.subr.mxu1 %v90_v16  ;;  %v120_v50 = vld [vmem:[#allocation5 + $0x168] sm:$0xff]  ;;  %v119_v51 = vld [vmem:[#allocation5 + $0x160] sm:$0xff]  ;;  %v118_v52 = vld [vmem:[#allocation5 + $0x158] sm:$0xff] }
  0x2e   :  { %168 = vmatpush1.msra.mxu0 %v89_v17  ;;  %402 = vmatpush1.msra.mxu1 %v89_v17  ;;  %v117_v53 = vld [vmem:[#allocation5 + $0x150] sm:$0xff]  ;;  %v116_v54 = vld [vmem:[#allocation5 + $0x148] sm:$0xff]  ;;  %v115_v55 = vld [vmem:[#allocation5 + $0x140] sm:$0xff] }
  0x2f   :  { %169 = vmatprep.subr.mxu0 %v88_v18  ;;  %371 = vmatprep.subr.mxu1 %v88_v18  ;;  %v114_v56 = vld [vmem:[#allocation5 + $0x138] sm:$0xff]  ;;  %v113_v57 = vld [vmem:[#allocation5 + $0x130] sm:$0xff]  ;;  %v112_v58 = vld [vmem:[#allocation5 + $0x128] sm:$0xff] }
  0x30   :  { %170 = vmatpush1.msra.mxu0 %v87_v19  ;;  %403 = vmatpush1.msra.mxu1 %v87_v19  ;;  %v111_v59 = vld [vmem:[#allocation5 + $0x120] sm:$0xff]  ;;  %v110_v60 = vld [vmem:[#allocation5 + $0x118] sm:$0xff]  ;;  %v109_v61 = vld [vmem:[#allocation5 + $0x110] sm:$0xff] }
  0x31   :  { %171 = vmatprep.subr.mxu0 %v86_v20  ;;  %372 = vmatprep.subr.mxu1 %v86_v20  ;;  %v108_v62 = vld [vmem:[#allocation5 + $0x108] sm:$0xff]  ;;  %v107_v63 = vld [vmem:[#allocation5 + $0x100] sm:$0xff]  ;;  %v46_v4 = vld [vmem:[#allocation2 + $0x18] sm:$0xff] }
  0x32   :  { %172 = vmatpush1.msra.mxu0 %v85_v21  ;;  %404 = vmatpush1.msra.mxu1 %v85_v21  ;;  %v44_v0 = vld [vmem:[#allocation2 + $0x8] sm:$0xff]  ;;  %v43_v2 = vld [vmem:[#allocation2] sm:$0xff]  ;;  %v62_v5 = vld [vmem:[#allocation2 + $0x98] sm:$0xff] }
  0x33   :  { %173 = vmatprep.subr.mxu0 %v84_v22  ;;  %373 = vmatprep.subr.mxu1 %v84_v22  ;;  %v60_v1 = vld [vmem:[#allocation2 + $0x88] sm:$0xff]  ;;  %v59_v3 = vld [vmem:[#allocation2 + $0x80] sm:$0xff]  ;;  %v45_v6 = vld [vmem:[#allocation2 + $0x10] sm:$0xff] }
  0x34   :  { %174 = vmatpush1.msra.mxu0 %v83_v23  ;;  %405 = vmatpush1.msra.mxu1 %v83_v23  ;;  %v61_v7 = vld [vmem:[#allocation2 + $0x90] sm:$0xff]  ;;  %v48_v8 = vld [vmem:[#allocation2 + $0x28] sm:$0xff]  ;;  %v47_v10 = vld [vmem:[#allocation2 + $0x20] sm:$0xff] }
  0x35   :  { %175 = vmatprep.subr.mxu0 %v82_v24  ;;  %374 = vmatprep.subr.mxu1 %v82_v24  ;;  %v64_v9 = vld [vmem:[#allocation2 + $0xa8] sm:$0xff]  ;;  %v63_v11 = vld [vmem:[#allocation2 + $0xa0] sm:$0xff]  ;;  %v50_v12 = vld [vmem:[#allocation2 + $0x38] sm:$0xff] }
  0x36   :  { %176 = vmatpush1.msra.mxu0 %v81_v25  ;;  %406 = vmatpush1.msra.mxu1 %v81_v25  ;;  %v66_v13 = vld [vmem:[#allocation2 + $0xb8] sm:$0xff]  ;;  %v49_v14 = vld [vmem:[#allocation2 + $0x30] sm:$0xff]  ;;  %v52_v16 = vld [vmem:[#allocation2 + $0x48] sm:$0xff] }
  0x37   :  { %177 = vmatprep.subr.mxu0 %v80_v26  ;;  %375 = vmatprep.subr.mxu1 %v80_v26  ;;  %v65_v15 = vld [vmem:[#allocation2 + $0xb0] sm:$0xff]  ;;  %v68_v17 = vld [vmem:[#allocation2 + $0xc8] sm:$0xff]  ;;  %v51_v18 = vld [vmem:[#allocation2 + $0x40] sm:$0xff] }
  0x38   :  { %178 = vmatpush1.msra.mxu0 %v79_v27  ;;  %407 = vmatpush1.msra.mxu1 %v79_v27  ;;  %v67_v19 = vld [vmem:[#allocation2 + $0xc0] sm:$0xff]  ;;  %v54_v20 = vld [vmem:[#allocation2 + $0x58] sm:$0xff]  ;;  %v53_v22 = vld [vmem:[#allocation2 + $0x50] sm:$0xff] }
  0x39   :  { %179 = vmatprep.subr.mxu0 %v78_v28  ;;  %376 = vmatprep.subr.mxu1 %v78_v28  ;;  %v70_v21 = vld [vmem:[#allocation2 + $0xd8] sm:$0xff]  ;;  %v69_v23 = vld [vmem:[#allocation2 + $0xd0] sm:$0xff]  ;;  %v56_v24 = vld [vmem:[#allocation2 + $0x68] sm:$0xff] }
  0x3a   :  { %180 = vmatpush1.msra.mxu0 %v77_v29  ;;  %408 = vmatpush1.msra.mxu1 %v77_v29  ;;  %v72_v25 = vld [vmem:[#allocation2 + $0xe8] sm:$0xff]  ;;  %v55_v26 = vld [vmem:[#allocation2 + $0x60] sm:$0xff]  ;;  %v58_v28 = vld [vmem:[#allocation2 + $0x78] sm:$0xff] }
  0x3b   :  { %181 = vmatprep.subr.mxu0 %v76_v30  ;;  %377 = vmatprep.subr.mxu1 %v76_v30  ;;  %v71_v27 = vld [vmem:[#allocation2 + $0xe0] sm:$0xff]  ;;  %v74_v29 = vld [vmem:[#allocation2 + $0xf8] sm:$0xff]  ;;  %v57_v30 = vld [vmem:[#allocation2 + $0x70] sm:$0xff] }
  0x3c   :  { %182 = vmatpush1.msra.mxu0 %v75_v31  ;;  %409 = vmatpush1.msra.mxu1 %v75_v31  ;;  %v73_v31 = vld [vmem:[#allocation2 + $0xf0] sm:$0xff] }
  0x3d   :  { %183 = vmatprep.subr.mxu0 %v138_v32  ;;  %378 = vmatprep.subr.mxu1 %v138_v32  ;;  %v141_v32 = vlaneseq }
  0x3e   :  { %184 = vmatpush2.msra.mxu0 %v137_v33  ;;  %410 = vmatpush2.msra.mxu1 %v137_v33 }
  0x3f   :  { %185 = vmatprep.subr.mxu0 %v136_v34  ;;  %379 = vmatprep.subr.mxu1 %v136_v34  ;;  %v142_v33 = vshrl.u32 %v141_v32, 7 }
  0x40   :  { %186 = vmatpush2.msra.mxu0 %v135_v35  ;;  %411 = vmatpush2.msra.mxu1 %v135_v35  ;;  %v139_v35 = vld [vmem:[%s581_s2] sm:$0x3]  ;;  %s501_s2 = smov [#allocation7]  }
  0x41   :  { %187 = vmatprep.subr.mxu0 %v134_v36  ;;  %380 = vmatprep.subr.mxu1 %v134_v36  ;;  %v143_v34 = vsub.s32 0, %v142_v33  ;;  %v147_v36 = vsub.s32 1, %v142_v33  ;;  %s349_s24 = sshll.u32 %s501_s2, 4  ;;  %s350_s24 = int_to_ptr.vmem [resolvable:$true] %s349_s24 }
  0x42   :  { %188 = vmatpush2.msra.mxu0 %v133_v37  ;;  %412 = vmatpush2.msra.mxu1 %v133_v37  ;;  %s471_s25 = scalar_lea.vmem %s350_s24, 4096  ;;  %p476_p11 = scmp.lt.s32.totalorder %s350_s24, %s350_s24 }
  0x43   :  { %189 = vmatprep.subr.mxu0 %v132_v38  ;;  %381 = vmatprep.subr.mxu1 %v132_v38  ;;  %v537_v37 = vrot.slane %v139_v35, %v143_v34  ;;  %v539_v38 = vrot.slane %v139_v35, %v147_v36  ;;  %p472_p10 = scmp.ne.s32.totalorder %s350_s24, %s471_s25  ;;  %p477_p12 = scmp.lt.s32.totalorder %s471_s25, %s471_s25 }
  0x44   :  { %190 = vmatpush2.msra.mxu0 %v131_v39  ;;  %413 = vmatpush2.msra.mxu1 %v131_v39 }
  0x45   :  { %191 = vmatprep.subr.mxu0 %v130_v40  ;;  %382 = vmatprep.subr.mxu1 %v130_v40  ;;  %p478_p13 = por %p477_p12, %p476_p11 }
  0x46   :  { %192 = vmatpush2.msra.mxu0 %v129_v41  ;;  %414 = vmatpush2.msra.mxu1 %v129_v41 }
  0x47   :  { %193 = vmatprep.subr.mxu0 %v128_v42  ;;  %383 = vmatprep.subr.mxu1 %v128_v42  ;;  %p479_p0 = pnand %p478_p13, %p472_p10 }
  0x48   :  { %194 = vmatpush2.msra.mxu0 %v127_v43  ;;  %415 = vmatpush2.msra.mxu1 %v127_v43 }
  0x49   :  { %195 = vmatprep.subr.mxu0 %v126_v44  ;;  %384 = vmatprep.subr.mxu1 %v126_v44 }
  0x4a   :  { %196 = vmatpush2.msra.mxu0 %v125_v45  ;;  %416 = vmatpush2.msra.mxu1 %v125_v45 }
  0x4b   :  { %197 = vmatprep.subr.mxu0 %v124_v46  ;;  %385 = vmatprep.subr.mxu1 %v124_v46 }
  0x4c   :  { %198 = vmatpush2.msra.mxu0 %v123_v47  ;;  %417 = vmatpush2.msra.mxu1 %v123_v47 }
  0x4d   :  { %199 = vmatprep.subr.mxu0 %v122_v48  ;;  %386 = vmatprep.subr.mxu1 %v122_v48 }
  0x4e   :  { %200 = vmatpush2.msra.mxu0 %v121_v49  ;;  %418 = vmatpush2.msra.mxu1 %v121_v49 }
  0x4f   :  { %201 = vmatprep.subr.mxu0 %v120_v50  ;;  %387 = vmatprep.subr.mxu1 %v120_v50 }
  0x50   :  { %202 = vmatpush2.msra.mxu0 %v119_v51  ;;  %419 = vmatpush2.msra.mxu1 %v119_v51 }
  0x51   :  { %203 = vmatprep.subr.mxu0 %v118_v52  ;;  %388 = vmatprep.subr.mxu1 %v118_v52 }
  0x52   :  { %204 = vmatpush2.msra.mxu0 %v117_v53  ;;  %420 = vmatpush2.msra.mxu1 %v117_v53 }
  0x53   :  { %205 = vmatprep.subr.mxu0 %v116_v54  ;;  %389 = vmatprep.subr.mxu1 %v116_v54 }
  0x54   :  { %206 = vmatpush2.msra.mxu0 %v115_v55  ;;  %421 = vmatpush2.msra.mxu1 %v115_v55 }
  0x55   :  { %207 = vmatprep.subr.mxu0 %v114_v56  ;;  %390 = vmatprep.subr.mxu1 %v114_v56 }
  0x56   :  { %208 = vmatpush2.msra.mxu0 %v113_v57  ;;  %422 = vmatpush2.msra.mxu1 %v113_v57 }
  0x57   :  { %209 = vmatprep.subr.mxu0 %v112_v58  ;;  %391 = vmatprep.subr.mxu1 %v112_v58 }
  0x58   :  { %210 = vmatpush2.msra.mxu0 %v111_v59  ;;  %423 = vmatpush2.msra.mxu1 %v111_v59 }
  0x59   :  { %211 = vmatprep.subr.mxu0 %v110_v60  ;;  %392 = vmatprep.subr.mxu1 %v110_v60 }
  0x5a   :  { %212 = vmatpush2.msra.mxu0 %v109_v61  ;;  %424 = vmatpush2.msra.mxu1 %v109_v61 }
  0x5b   :  { %213 = vmatprep.subr.mxu0 %v108_v62  ;;  %393 = vmatprep.subr.mxu1 %v108_v62 }
  0x5c   :  { %214 = vmatpush2.msra.mxu0 %v107_v63  ;;  %425 = vmatpush2.msra.mxu1 %v107_v63 }
  0x5d   :  { %215 = vmatprep.mubr.f32.mxu0 %v44_v0  ;;  %263 = vmatprep.mubr.f32.mxu1 %v60_v1 }
  0x5e   :  { %216 = vmatmul.mubr.f32.vlgmr.msra.gmra.mxu0 %v43_v2  ;;  %264 = vmatmul.mubr.f32.vlgmr.msra.gmra.mxu1 %v59_v3 }
  0x5f   :  { %221 = vmatprep.mubr.f32.mxu0 %v46_v4  ;;  %269 = vmatprep.mubr.f32.mxu1 %v62_v5 }
  0x62   :  { %222 = vmatmul.mubr.f32.gmra.mxu0 %v45_v6  ;;  %270 = vmatmul.mubr.f32.gmra.mxu1 %v61_v7 }
  0x63   :  { %227 = vmatprep.mubr.f32.mxu0 %v48_v8  ;;  %275 = vmatprep.mubr.f32.mxu1 %v64_v9 }
  0x66   :  { %228 = vmatmul.mubr.f32.gmra.mxu0 %v47_v10  ;;  %276 = vmatmul.mubr.f32.gmra.mxu1 %v63_v11 }
  0x67   :  { %233 = vmatprep.mubr.f32.mxu0 %v50_v12  ;;  %281 = vmatprep.mubr.f32.mxu1 %v66_v13 }
  0x6a   :  { %234 = vmatmul.mubr.f32.gmra.mxu0 %v49_v14  ;;  %282 = vmatmul.mubr.f32.gmra.mxu1 %v65_v15 }
  0x6b   :  { %239 = vmatprep.mubr.f32.mxu0 %v52_v16  ;;  %287 = vmatprep.mubr.f32.mxu1 %v68_v17 }
  0x6e   :  { %240 = vmatmul.mubr.f32.gmra.mxu0 %v51_v18  ;;  %288 = vmatmul.mubr.f32.gmra.mxu1 %v67_v19 }
  0x6f   :  { %245 = vmatprep.mubr.f32.mxu0 %v54_v20  ;;  %293 = vmatprep.mubr.f32.mxu1 %v70_v21 }
  0x72   :  { %246 = vmatmul.mubr.f32.gmra.mxu0 %v53_v22  ;;  %294 = vmatmul.mubr.f32.gmra.mxu1 %v69_v23 }
  0x73   :  { %251 = vmatprep.mubr.f32.mxu0 %v56_v24  ;;  %299 = vmatprep.mubr.f32.mxu1 %v72_v25 }
  0x76   :  { %252 = vmatmul.mubr.f32.gmra.mxu0 %v55_v26  ;;  %300 = vmatmul.mubr.f32.gmra.mxu1 %v71_v27 }
  0x77   :  { %257 = vmatprep.mubr.f32.mxu0 %v58_v28  ;;  %305 = vmatprep.mubr.f32.mxu1 %v74_v29 }
  0x7a   :  { %258 = vmatmul.mubr.f32.gmra.mxu0 %v57_v30  ;;  %306 = vmatmul.mubr.f32.gmra.mxu1 %v73_v31 }
 0x11e   :  { %v217_v39 = vpop.f32.mrf.mxu0  ;;  %v265_v40 = vpop.f32.mrf.mxu1 }
 0x11f   :  { %v218_v41 = vadd.f32 %v217_v39, %v537_v37  ;;  %v266_v42 = vadd.f32 %v265_v40, %v537_v37 }
 0x120   :  { %v219_v43 = vpop.f32.mrf.mxu0  ;;  %v267_v44 = vpop.f32.mrf.mxu1 }
 0x121   :  { %312 = vst [vmem:[#allocation7] sm:$0xff] %v218_v41  ;;  %328 = vst [vmem:[#allocation7 + $0x80] sm:$0xff] %v266_v42  ;;  %v220_v45 = vadd.f32 %v219_v43, %v539_v38  ;;  %v268_v46 = vadd.f32 %v267_v44, %v539_v38 }
 0x122   :  { %v223_v47 = vpop.f32.mrf.mxu0  ;;  %v271_v48 = vpop.f32.mrf.mxu1 }
 0x123   :  { %313 = vst [vmem:[#allocation7 + $0x8] sm:$0xff] %v220_v45  ;;  %329 = vst [vmem:[#allocation7 + $0x88] sm:$0xff] %v268_v46  ;;  %v224_v49 = vadd.f32 %v223_v47, %v537_v37  ;;  %v272_v50 = vadd.f32 %v271_v48, %v537_v37 }
 0x124   :  { %v225_v51 = vpop.f32.mrf.mxu0  ;;  %v273_v52 = vpop.f32.mrf.mxu1 }
 0x125   :  { %314 = vst [vmem:[#allocation7 + $0x10] sm:$0xff] %v224_v49  ;;  %330 = vst [vmem:[#allocation7 + $0x90] sm:$0xff] %v272_v50  ;;  %v226_v53 = vadd.f32 %v225_v51, %v539_v38  ;;  %v274_v54 = vadd.f32 %v273_v52, %v539_v38 }
 0x126   :  { %v229_v55 = vpop.f32.mrf.mxu0  ;;  %v277_v56 = vpop.f32.mrf.mxu1 }
 0x127   :  { %315 = vst [vmem:[#allocation7 + $0x18] sm:$0xff] %v226_v53  ;;  %331 = vst [vmem:[#allocation7 + $0x98] sm:$0xff] %v274_v54  ;;  %v230_v57 = vadd.f32 %v229_v55, %v537_v37  ;;  %v278_v58 = vadd.f32 %v277_v56, %v537_v37 }
 0x128   :  { %v231_v59 = vpop.f32.mrf.mxu0  ;;  %v279_v60 = vpop.f32.mrf.mxu1 }
 0x129   :  { %316 = vst [vmem:[#allocation7 + $0x20] sm:$0xff] %v230_v57  ;;  %332 = vst [vmem:[#allocation7 + $0xa0] sm:$0xff] %v278_v58  ;;  %v232_v61 = vadd.f32 %v231_v59, %v539_v38  ;;  %v280_v62 = vadd.f32 %v279_v60, %v539_v38 }
 0x12a   :  { %v235_v63 = vpop.f32.mrf.mxu0  ;;  %v283_v0 = vpop.f32.mrf.mxu1 }
 0x12b   :  { %317 = vst [vmem:[#allocation7 + $0x28] sm:$0xff] %v232_v61  ;;  %333 = vst [vmem:[#allocation7 + $0xa8] sm:$0xff] %v280_v62  ;;  %v236_v1 = vadd.f32 %v235_v63, %v537_v37  ;;  %v284_v2 = vadd.f32 %v283_v0, %v537_v37 }
 0x12c   :  { %v237_v3 = vpop.f32.mrf.mxu0  ;;  %v285_v4 = vpop.f32.mrf.mxu1 }
 0x12d   :  { %318 = vst [vmem:[#allocation7 + $0x30] sm:$0xff] %v236_v1  ;;  %334 = vst [vmem:[#allocation7 + $0xb0] sm:$0xff] %v284_v2  ;;  %v238_v5 = vadd.f32 %v237_v3, %v539_v38  ;;  %v286_v6 = vadd.f32 %v285_v4, %v539_v38 }
 0x12e   :  { %v241_v7 = vpop.f32.mrf.mxu0  ;;  %v289_v8 = vpop.f32.mrf.mxu1 }
 0x12f   :  { %319 = vst [vmem:[#allocation7 + $0x38] sm:$0xff] %v238_v5  ;;  %335 = vst [vmem:[#allocation7 + $0xb8] sm:$0xff] %v286_v6  ;;  %v242_v9 = vadd.f32 %v241_v7, %v537_v37  ;;  %v290_v10 = vadd.f32 %v289_v8, %v537_v37 }
 0x130   :  { %v243_v11 = vpop.f32.mrf.mxu0  ;;  %v291_v12 = vpop.f32.mrf.mxu1 }
 0x131   :  { %320 = vst [vmem:[#allocation7 + $0x40] sm:$0xff] %v242_v9  ;;  %336 = vst [vmem:[#allocation7 + $0xc0] sm:$0xff] %v290_v10  ;;  %v244_v13 = vadd.f32 %v243_v11, %v539_v38  ;;  %v292_v14 = vadd.f32 %v291_v12, %v539_v38 }
 0x132   :  { %v247_v15 = vpop.f32.mrf.mxu0  ;;  %v295_v16 = vpop.f32.mrf.mxu1 }
 0x133   :  { %321 = vst [vmem:[#allocation7 + $0x48] sm:$0xff] %v244_v13  ;;  %337 = vst [vmem:[#allocation7 + $0xc8] sm:$0xff] %v292_v14  ;;  %v248_v17 = vadd.f32 %v247_v15, %v537_v37  ;;  %v296_v18 = vadd.f32 %v295_v16, %v537_v37 }
 0x134   :  { %v249_v19 = vpop.f32.mrf.mxu0  ;;  %v297_v20 = vpop.f32.mrf.mxu1 }
 0x135   :  { %322 = vst [vmem:[#allocation7 + $0x50] sm:$0xff] %v248_v17  ;;  %338 = vst [vmem:[#allocation7 + $0xd0] sm:$0xff] %v296_v18  ;;  %v250_v21 = vadd.f32 %v249_v19, %v539_v38  ;;  %v298_v22 = vadd.f32 %v297_v20, %v539_v38 }
 0x136   :  { %v253_v23 = vpop.f32.mrf.mxu0  ;;  %v301_v24 = vpop.f32.mrf.mxu1 }
 0x137   :  { %323 = vst [vmem:[#allocation7 + $0x58] sm:$0xff] %v250_v21  ;;  %339 = vst [vmem:[#allocation7 + $0xd8] sm:$0xff] %v298_v22  ;;  %v254_v25 = vadd.f32 %v253_v23, %v537_v37  ;;  %v302_v26 = vadd.f32 %v301_v24, %v537_v37 }
 0x138   :  { %v255_v27 = vpop.f32.mrf.mxu0  ;;  %v303_v28 = vpop.f32.mrf.mxu1 }
 0x139   :  { %324 = vst [vmem:[#allocation7 + $0x60] sm:$0xff] %v254_v25  ;;  %340 = vst [vmem:[#allocation7 + $0xe0] sm:$0xff] %v302_v26  ;;  %v256_v29 = vadd.f32 %v255_v27, %v539_v38  ;;  %v304_v30 = vadd.f32 %v303_v28, %v539_v38 }
 0x13a   :  { %v259_v31 = vpop.f32.mrf.mxu0  ;;  %v307_v32 = vpop.f32.mrf.mxu1 }
 0x13b   :  { %325 = vst [vmem:[#allocation7 + $0x68] sm:$0xff] %v256_v29  ;;  %341 = vst [vmem:[#allocation7 + $0xe8] sm:$0xff] %v304_v30  ;;  %v260_v33 = vadd.f32 %v259_v31, %v537_v37  ;;  %v308_v34 = vadd.f32 %v307_v32, %v537_v37 }
 0x13c   :  { %v261_v35 = vpop.f32.mrf.mxu0  ;;  %v309_v36 = vpop.f32.mrf.mxu1 }
 0x13d   :  { %326 = vst [vmem:[#allocation7 + $0x70] sm:$0xff] %v260_v33  ;;  %342 = vst [vmem:[#allocation7 + $0xf0] sm:$0xff] %v308_v34  ;;  %v262_v39 = vadd.f32 %v261_v35, %v539_v38  ;;  %v310_v40 = vadd.f32 %v309_v36, %v539_v38 }
 0x13f   :  { %327 = vst [vmem:[#allocation7 + $0x78] sm:$0xff] %v262_v39  ;;  %343 = vst [vmem:[#allocation7 + $0xf8] sm:$0xff] %v310_v40 }
 0x140   :  { %482 = shalt.err (!%p479_p0)
}
 0x141   :  { %355 = dma.vmem_to_hbm [thread:$0]  %s350_s24, 4096, %s582_s3, [#allocation4], %s498_s15, %s498_s15, %s499_s16  }
 0x142   :  { %495 = dma.done.wait [#allocation4], 4096  }
 0x143   :  { %496 = vsyncadd [#allocation4], 4294963200 }
 0x144   :  { %359 = vsyncpa [#allocation3], 1 }
 0x145   :  { %360 = vsyncpa [#allocation6], 1 }
 0x146   :  { %361 = vsyncpa [#allocation4], 1 }

</bundles_post_ra>
